<compile_context>
chip_gen: v7x
topology: tpu7x:2x2x1
jax: 0.10.0
libtpu: 0.0.40
codegen_flags: <defaults>
</compile_context>

<pallas_src>
import functools

import jax
import jax.numpy as jnp
from jax.experimental import pallas as pl
from jax.experimental.pallas import tpu as pltpu


_TM_MAX, _TN_MAX, _TK_MAX = 512, 1024, 2048
_VMEM_LIMIT = 40 * 1024 * 1024          # safe on v5e/v6e (128 MiB) and v7x (64 MiB)
_FUSED_VMEM_BUDGET = 20 * 1024 * 1024   # conservative all-resident budget


def _round_up(x, m):
    return (x + m - 1) // m * m


# ---------------------------------------------------------------------------
# Fused path: embedding gather (as exact one-hot MXU matmuls) + NT score
# matmul in ONE kernel call, everything resident in VMEM.  No padding, no HBM
# intermediates, no extra XLA ops around the kernel.
# ---------------------------------------------------------------------------
def _fused_skipgram_kernel(tgt_ref, ctx_ref, in_tbl_ref, out_tbl_ref, scores_ref):
    # tgt_ref: [T, 1] i32, ctx_ref: [C, 1] i32, tables: [V, D] f32.
    V = in_tbl_ref.shape[0]
    T = tgt_ref.shape[0]
    C = ctx_ref.shape[0]

    # One-hot rows are exact 0/1 in bf16, so onehot @ table picks exactly the
    # bf16-rounded embedding rows (== take(...).astype(bf16) semantics).
    tgt_oh = jnp.where(
        jax.lax.broadcasted_iota(jnp.int32, (T, V), 1) == tgt_ref[...],
        1.0, 0.0).astype(jnp.bfloat16)
    ctx_oh = jnp.where(
        jax.lax.broadcasted_iota(jnp.int32, (C, V), 1) == ctx_ref[...],
        1.0, 0.0).astype(jnp.bfloat16)

    in_emb = jnp.dot(tgt_oh, in_tbl_ref[...].astype(jnp.bfloat16),
                     preferred_element_type=jnp.float32)       # [T, D]
    out_emb = jnp.dot(ctx_oh, out_tbl_ref[...].astype(jnp.bfloat16),
                      preferred_element_type=jnp.float32)      # [C, D]

    # NT contraction (q @ k.T form): contract last dims, no transpose needed.
    scores = jax.lax.dot_general(
        in_emb.astype(jnp.bfloat16), out_emb.astype(jnp.bfloat16),
        dimension_numbers=(((1,), (1,)), ((), ())),
        preferred_element_type=jnp.float32)                    # [T, C]
    scores_ref[...] = scores.astype(scores_ref.dtype)


def _fused_fits(V, D, T, C, out_dtype):
    """Can tables + one-hots + gathered rows + output all sit in VMEM at once?"""
    Vs, Vl = _round_up(V, 8), _round_up(V, 128)
    Dl = _round_up(D, 128)
    Ts, Cs = _round_up(T, 16), _round_up(C, 16)
    Cl = _round_up(C, 128)
    tables = 2 * Vs * Dl * 4
    onehots = (Ts + Cs) * Vl * 2
    gathered = (Ts + Cs) * Dl * (4 + 2)
    out = Ts * Cl * (jnp.dtype(out_dtype).itemsize + 4)
    total = tables + onehots + gathered + out
    return total <= _FUSED_VMEM_BUDGET and T <= 4096 and C <= 4096


# ---------------------------------------------------------------------------
# General path: tiled NT matmul kernel (gathered bf16 embeddings from the
# wrapper).  Single-K variant (no accumulator) for Dp <= tk, multi-K otherwise.
# ---------------------------------------------------------------------------
def _nt_kernel(a_ref, b_ref, o_ref):
    # a: [tm, tk], b: [tn, tk]  ->  o: [tm, tn]   (NT matmul on the MXU)
    o_ref[...] = jax.lax.dot_general(
        a_ref[...], b_ref[...],
        dimension_numbers=(((1,), (1,)), ((), ())),
        preferred_element_type=jnp.float32).astype(o_ref.dtype)


def _nt_kernel_acc(a_ref, b_ref, o_ref, acc_ref):
    @pl.when(pl.program_id(2) == 0)
    def _():
        acc_ref[...] = jnp.zeros_like(acc_ref)

    acc_ref[...] += jax.lax.dot_general(
        a_ref[...], b_ref[...],
        dimension_numbers=(((1,), (1,)), ((), ())),
        preferred_element_type=jnp.float32)

    @pl.when(pl.program_id(2) == pl.num_programs(2) - 1)
    def _():
        o_ref[...] = acc_ref[...].astype(o_ref.dtype)


def _pick_tiles(T, C, D):
    tk = min(_TK_MAX, _round_up(D, 128))
    tm = min(_TM_MAX, _round_up(T, 16))     # bf16 sublane packing
    tn = min(_TN_MAX, _round_up(C, 128))    # lane dim of the output
    # v7x megacore: keep >=2 blocks along a parallel axis when possible so both
    # TensorCores get work; split N first (skip-gram T is often small).
    n_blocks = (_round_up(T, tm) // tm) * (_round_up(C, tn) // tn)
    if n_blocks < 2:
        if C > 128:
            tn = _round_up(pl.cdiv(C, 2), 128)
        elif T > 16:
            tm = _round_up(pl.cdiv(T, 2), 16)
    return tm, tn, tk


def _scores_general(in_emb, out_emb, out_dtype):
    """in_emb: [T, D] bf16, out_emb: [C, D] bf16 -> [T, C] out_dtype."""
    T, D = in_emb.shape
    C = out_emb.shape[0]
    tm, tn, tk = _pick_tiles(T, C, D)
    Tp, Cp, Dp = _round_up(T, tm), _round_up(C, tn), _round_up(D, tk)

    # Fused zero-pad (one XLA pass, fuses with the upstream gather + bf16 cast).
    # K must stay zero-padded so the contraction is exact.
    lhs = jnp.pad(in_emb, ((0, Tp - T), (0, Dp - D)))   # [Tp, Dp]
    rhs = jnp.pad(out_emb, ((0, Cp - C), (0, Dp - D)))  # [Cp, Dp]  (no transpose)

    out_bytes = jnp.dtype(out_dtype).itemsize
    cost = pl.CostEstimate(
        flops=2 * Tp * Cp * Dp,
        transcendentals=0,
        bytes_accessed=((Cp // tn) * Tp * Dp * 2        # lhs re-streamed per N pass
                        + (Tp // tm) * Cp * Dp * 2      # rhs re-streamed per M pass
                        + Tp * Cp * out_bytes),
    )

    if Dp <= tk:  # single K step: no accumulator scratch, no init/finalize
        grid = (Tp // tm, Cp // tn)
        in_specs = [pl.BlockSpec((tm, tk), lambda i, j: (i, 0)),
                    pl.BlockSpec((tn, tk), lambda i, j: (j, 0))]
        out_specs = pl.BlockSpec((tm, tn), lambda i, j: (i, j))
        scratch = []
        kernel = _nt_kernel
        sem = ("parallel", "parallel")
    else:
        grid = (Tp // tm, Cp // tn, Dp // tk)
        in_specs = [pl.BlockSpec((tm, tk), lambda i, j, k: (i, k)),
                    pl.BlockSpec((tn, tk), lambda i, j, k: (j, k))]
        out_specs = pl.BlockSpec((tm, tn), lambda i, j, k: (i, j))
        scratch = [pltpu.VMEM((tm, tn), jnp.float32)]
        kernel = _nt_kernel_acc
        sem = ("parallel", "parallel", "arbitrary")

    scores_p = pl.pallas_call(
        kernel,
        out_shape=jax.ShapeDtypeStruct((Tp, Cp), out_dtype),
        grid_spec=pltpu.PrefetchScalarGridSpec(
            num_scalar_prefetch=0,
            grid=grid,
            in_specs=in_specs,
            out_specs=out_specs,
            scratch_shapes=scratch,
        ),
        compiler_params=pltpu.CompilerParams(
            dimension_semantics=sem,
            vmem_limit_bytes=_VMEM_LIMIT,
        ),
        cost_estimate=cost,
    )(lhs, rhs)
    return scores_p[:T, :C]


# ---------------------------------------------------------------------------
# Public forward.
# ---------------------------------------------------------------------------
@functools.partial(jax.jit, static_argnames=("out_dtype", "force_general"))
def skipgram_forward(in_embed, out_embed, target, context,
                     out_dtype=jnp.float32, force_general=False):
    """scores[t, c] = <in_embed[target[t]], out_embed[context[c]]>."""
    V, D = in_embed.shape
    T = int(target.shape[0])
    C = int(context.shape[0])

    if not force_general and _fused_fits(V, D, T, C, out_dtype):
        cost = pl.CostEstimate(
            flops=2 * (T + C) * V * D + 2 * T * C * D,
            transcendentals=0,
            bytes_accessed=(2 * V * D * 4 + (T + C) * 4
                            + T * C * jnp.dtype(out_dtype).itemsize),
        )
        return pl.pallas_call(
            _fused_skipgram_kernel,
            out_shape=jax.ShapeDtypeStruct((T, C), out_dtype),
            compiler_params=pltpu.CompilerParams(vmem_limit_bytes=_VMEM_LIMIT),
            cost_estimate=cost,
        )(target.astype(jnp.int32).reshape(T, 1),
          context.astype(jnp.int32).reshape(C, 1),
          in_embed, out_embed)

    # Large-vocab / large-batch path: gather + bf16 cast in the wrapper (one
    # fused XLA pass), tiled NT score matmul in the Pallas kernel.
    # TODO(synk): replace with an in-kernel manual-DMA row gather (pl.ANY
    #             tables + scalar-prefetched index arrays).
    in_emb = jnp.take(in_embed, target, axis=0).astype(jnp.bfloat16)     # [T, D]
    out_emb = jnp.take(out_embed, context, axis=0).astype(jnp.bfloat16)  # [C, D]
    return _scores_general(in_emb, out_emb, out_dtype)


if __name__ == "__main__":
    key = jax.random.PRNGKey(0)

    def _ref_bf16(in_e, out_e, t, c):
        a = jnp.take(in_e, t, axis=0).astype(jnp.bfloat16).astype(jnp.float32)
        b = jnp.take(out_e, c, axis=0).astype(jnp.bfloat16).astype(jnp.float32)
        return a @ b.T

    # --- Small config matching the PyTorch module (fused in-kernel gather) ---
    vocab_size, embed_dim, T, C = 20, 50, 8, 8
    k_in, k_out, k_t, k_c, key = jax.random.split(key, 5)
    in_embed = jax.random.normal(k_in, (vocab_size, embed_dim), dtype=jnp.float32)
    out_embed = jax.random.normal(k_out, (vocab_size, embed_dim), dtype=jnp.float32)
    target = jax.random.randint(k_t, (T,), 0, vocab_size, dtype=jnp.int32)
    context = jax.random.randint(k_c, (C,), 0, vocab_size, dtype=jnp.int32)

    scores = jax.block_until_ready(
        skipgram_forward(in_embed, out_embed, target, context))
    assert scores.shape == (T, C)

    ref = _ref_bf16(in_embed, out_embed, target, context)
    assert jnp.allclose(scores, ref, atol=2e-3, rtol=2e-3), (
        float(jnp.max(jnp.abs(scores - ref))))
    ref_f32 = (jnp.take(in_embed, target, axis=0)
               @ jnp.take(out_embed, context, axis=0).T)
    assert jnp.allclose(scores, ref_f32, atol=5e-2, rtol=5e-2)

    # --- Larger config exercising the tiled general path (padding + NT matmul,
    #     >=2 output blocks so both v7x TensorCores are used) ---
    V2, D2, T2, C2 = 300, 50, 200, 160
    k_in, k_out, k_t, k_c, key = jax.random.split(key, 5)
    in2 = jax.random.normal(k_in, (V2, D2), dtype=jnp.float32)
    out2 = jax.random.normal(k_out, (V2, D2), dtype=jnp.float32)
    t2 = jax.random.randint(k_t, (T2,), 0, V2, dtype=jnp.int32)
    c2 = jax.random.randint(k_c, (C2,), 0, V2, dtype=jnp.int32)

    scores2 = jax.block_until_ready(
        skipgram_forward(in2, out2, t2, c2, force_general=True))
    assert scores2.shape == (T2, C2)
    ref2 = _ref_bf16(in2, out2, t2, c2)
    assert jnp.allclose(scores2, ref2, atol=2e-3, rtol=2e-3), (
        float(jnp.max(jnp.abs(scores2 - ref2))))

    print("KERNEL_OK")
</pallas_src>

<mosaic_0001>
module attributes {stable_mosaic.version = 11 : i64} {
  func.func @_fused_skipgram_kernel(%arg0: memref<8x1xi32, #tpu.memory_space<vmem>>, %arg1: memref<8x1xi32, #tpu.memory_space<vmem>>, %arg2: memref<20x50xf32, #tpu.memory_space<vmem>>, %arg3: memref<20x50xf32, #tpu.memory_space<vmem>>, %arg4: memref<8x8xf32, #tpu.memory_space<vmem>>) attributes {dimension_semantics = [], scalar_prefetch = 0 : i64, scratch_operands = 0 : i64, tpu.core_type = #tpu.core_type<tc>} {
    %0 = tpu.iota {dimensions = array<i32: 1>} : vector<8x20xi32>
    %c0 = arith.constant 0 : index
    %c0_0 = arith.constant 0 : index
    %1 = vector.load %arg0[%c0, %c0_0] : memref<8x1xi32, #tpu.memory_space<vmem>>, vector<8x1xi32>
    %2 = vector.broadcast %1 : vector<8x1xi32> to vector<8x20xi32>
    %3 = arith.cmpi eq, %0, %2 : vector<8x20xi32>
    %cst = arith.constant 1.000000e+00 : f32
    %cst_1 = arith.constant 0.000000e+00 : f32
    %4 = vector.broadcast %cst : f32 to vector<8x20xf32>
    %5 = vector.broadcast %cst_1 : f32 to vector<8x20xf32>
    %6 = arith.select %3, %4, %5 : vector<8x20xi1>, vector<8x20xf32>
    %7 = arith.truncf %6 : vector<8x20xf32> to vector<8x20xbf16>
    %8 = tpu.iota {dimensions = array<i32: 1>} : vector<8x20xi32>
    %c0_2 = arith.constant 0 : index
    %c0_3 = arith.constant 0 : index
    %9 = vector.load %arg1[%c0_2, %c0_3] : memref<8x1xi32, #tpu.memory_space<vmem>>, vector<8x1xi32>
    %10 = vector.broadcast %9 : vector<8x1xi32> to vector<8x20xi32>
    %11 = arith.cmpi eq, %8, %10 : vector<8x20xi32>
    %cst_4 = arith.constant 1.000000e+00 : f32
    %cst_5 = arith.constant 0.000000e+00 : f32
    %12 = vector.broadcast %cst_4 : f32 to vector<8x20xf32>
    %13 = vector.broadcast %cst_5 : f32 to vector<8x20xf32>
    %14 = arith.select %11, %12, %13 : vector<8x20xi1>, vector<8x20xf32>
    %15 = arith.truncf %14 : vector<8x20xf32> to vector<8x20xbf16>
    %c0_6 = arith.constant 0 : index
    %c0_7 = arith.constant 0 : index
    %16 = vector.load %arg2[%c0_6, %c0_7] : memref<20x50xf32, #tpu.memory_space<vmem>>, vector<20x50xf32>
    %17 = arith.truncf %16 : vector<20x50xf32> to vector<20x50xbf16>
    %cst_8 = arith.constant dense<0.000000e+00> : vector<8x50xf32>
    %18 = tpu.matmul %7, %17, %cst_8 {dimension_numbers = #tpu.dot_dimension_numbers<[1], [0], [0], [1], [0, 0, 1, 1], [], []>} : vector<8x20xbf16>, vector<20x50xbf16>, vector<8x50xf32> -> vector<8x50xf32>
    %c0_9 = arith.constant 0 : index
    %c0_10 = arith.constant 0 : index
    %19 = vector.load %arg3[%c0_9, %c0_10] : memref<20x50xf32, #tpu.memory_space<vmem>>, vector<20x50xf32>
    %20 = arith.truncf %19 : vector<20x50xf32> to vector<20x50xbf16>
    %cst_11 = arith.constant dense<0.000000e+00> : vector<8x50xf32>
    %21 = tpu.matmul %15, %20, %cst_11 {dimension_numbers = #tpu.dot_dimension_numbers<[1], [0], [0], [1], [0, 0, 1, 1], [], []>} : vector<8x20xbf16>, vector<20x50xbf16>, vector<8x50xf32> -> vector<8x50xf32>
    %22 = arith.truncf %18 : vector<8x50xf32> to vector<8x50xbf16>
    %23 = arith.truncf %21 : vector<8x50xf32> to vector<8x50xbf16>
    %cst_12 = arith.constant dense<0.000000e+00> : vector<8x8xf32>
    %24 = tpu.matmul %22, %23, %cst_12 {dimension_numbers = #tpu.dot_dimension_numbers<[1], [1], [0], [0], [0, 0, 1, 0], [], []>} : vector<8x50xbf16>, vector<8x50xbf16>, vector<8x8xf32> -> vector<8x8xf32>
    %c0_13 = arith.constant 0 : index
    %c0_14 = arith.constant 0 : index
    %25 = vector.load %arg4[%c0_13, %c0_14] : memref<8x8xf32, #tpu.memory_space<vmem>>, vector<8x8xf32>
    tpu.vector_store %arg4[%c0_13, %c0_14], %24 {strides = array<i32>} : memref<8x8xf32, #tpu.memory_space<vmem>>, vector<8x8xf32>,
    return
  }
}

</mosaic_0001>

<bundles_post_ra>
// kernel: skipgram_forward.1
= control target key start
LH: loop header
LB: loop body
LE: loop exit
PB: predicated region body
PF: predicated region fallthrough
CT: control target
= control target key end

     0   :  { %9 = vsyncpa [#allocation3], 0  ;;  %s382_s0 = inlined_call_operand.vmem [shape: s32[8,1], index: 0, kind: input, shape index: {}]   ;;  %s383_s1 = inlined_call_operand.vmem [shape: s32[8,1], index: 1, kind: input, shape index: {}]   ;;  %s384_s2 = inlined_call_operand.vmem [shape: f32[20,50], index: 2, kind: input, shape index: {}]   ;;  %s385_s3 = inlined_call_operand.hbm [shape: f32[20,50], index: 3, kind: input, shape index: {}]   ;;  %s386_s4 = inlined_call_operand.hbm [shape: f32[8,8], index: 4, kind: output, shape index: {}]  }
   0x1   :  { %10 = vsyncpa [#allocation4], 0  ;;  %s308_s15 = smov [#allocation2]   ;;  %s260_s19 = scalar_lea.hbm %s385_s3, 384 }
   0x2   :  { %s22_s16 = sshll.u32 %s308_s15, 4  ;;  %p261_p0 = scmp.ne.s32.totalorder %s385_s3, %s260_s19  ;;  %s23_s16 = int_to_ptr.vmem [resolvable:$true] %s22_s16 }
   0x3   :  { %p264_p1 = scmp.lt.u32.totalorder %s260_s19, %s385_s3 }
   0x5   :  { %p266_p2 = pnand %p264_p1, %p261_p0 }
   0x7   :  { %269 = shalt.err (!%p266_p2)
}
   0x8   :  { %s270_s24 = scalar_lea.vmem %s23_s16, 384  ;;  %p275_p4 = scmp.lt.s32.totalorder %s23_s16, %s23_s16 }
   0x9   :  { %p271_p3 = scmp.ne.s32.totalorder %s23_s16, %s270_s24  ;;  %p276_p5 = scmp.lt.s32.totalorder %s270_s24, %s270_s24 }
   0xb   :  { %p277_p6 = por %p276_p5, %p275_p4 }
   0xd   :  { %p278_p7 = pnand %p277_p6, %p271_p3 }
   0xf   :  { %281 = shalt.err (!%p278_p7)
}
  0x10   :  { %s309_s25 = smov 128   ;;  %s310_s26 = smov 8  }
  0x11   :  { %28 = dma.hbm_to_vmem [thread:$0]  %s385_s3, 384, %s23_s16, [#allocation3], %s309_s25, %s309_s25, %s310_s26  }
  0x12   :  { %304 = dma.done.wait [#allocation3], 384  }
  0x13   :  { %305 = vsyncadd [#allocation3], 4294966912  ;;  %v311_v0 = vmov 0   ;;  %v312_v1 = vmov 0.0   ;;  %v42_v2 = vld [vmem:[%s383_s1] sm:$0xff]  ;;  %v103_v4 = vld [vmem:[#allocation2 + $0x8] sm:$0xff]  ;;  %v33_v16 = vlaneseq }
  0x14   :  { %259 = vset.pattern.permute.xlu0 %v311_v0  ;;  %238 = vmatprep.subr.bf16.mxu1 %v312_v1  ;;  %v102_v3 = vld [vmem:[#allocation2] sm:$0xff]  ;;  %v50_v6 = vld [vmem:[%s384_s2 + $0x8] sm:$0xff]  ;;  %vm58_vm0 = vcmask 1041408   ;;  %v104_v10 = vld [vmem:[#allocation2 + $0x10] sm:$0xf]  ;;  %vm313_vm1 = vmmov 0  }
  0x15   :  { %230 = vmatprep.subr.bf16.mxu0 %v312_v1  ;;  %44 = vperm.xlu0 %259, %v42_v2   ;;  %v49_v5 = vld [vmem:[%s384_s2] sm:$0xff]  ;;  %v105_v8 = vpack.c.bf16 %v103_v4, %v102_v3  ;;  %v51_v11 = vld [vmem:[%s384_s2 + $0x10] sm:$0xf]  ;;  %v106_v12 = vpack.c.bf16 %v104_v10, %v104_v10  ;;  %v34_v17 = vand.u32 127, %v33_v16  ;;  %vm54_vm3 = vcmask 162816  }
  0x16   :  { %v35_v7 = vld [vmem:[%s382_s0] sm:$0xff]  ;;  %v52_v9 = vpack.c.bf16 %v50_v6, %v49_v5  ;;  %v53_v13 = vpack.c.bf16 %v51_v11, %v51_v11  ;;  %242 = vmatprep.mubr.msk.bf16.mxu1 %vm313_vm1, %v312_v1  ;;  %234 = vmatprep.mubr.msk.bf16.mxu0 %vm313_vm1, %v312_v1  ;;  %vm155_vm5 = vcmask 408576   ;;  %s314_s0 = smov [#allocation5]   ;;  %vm202_vm6 = vcmask 64512  }
  0x17   :  { %239 = vmatpush3.bf16.msra.mxu1 %v105_v8  ;;  %v111_v14 = vsel %vm58_vm0, %v106_v12, 0  ;;  %s210_s2 = sshll.u32 %s314_s0, 4  ;;  %s211_s2 = int_to_ptr.vmem [resolvable:$true] %s210_s2 }
  0x18   :  { %231 = vmatpush3.bf16.msra.mxu0 %v52_v9  ;;  %240 = vmatprep.subr.bf16.mxu1 %v312_v1  ;;  %v60_v15 = vsel %vm58_vm0, %v53_v13, 0  ;;  %s282_s11 = scalar_lea.vmem %s211_s2, 128  ;;  %p287_p9 = scmp.lt.s32.totalorder %s211_s2, %s211_s2 }
  0x19   :  { %37 = vperm.xlu0 %259, %v35_v7   ;;  %232 = vmatprep.subr.bf16.mxu0 %v312_v1  ;;  %p283_p8 = scmp.ne.s32.totalorder %s211_s2, %s282_s11  ;;  %p288_p10 = scmp.lt.s32.totalorder %s282_s11, %s282_s11 }
  0x1b   :  { %241 = vmatpush3.bf16.msra.mxu1 %v111_v14  ;;  %p289_p11 = por %p288_p10, %p287_p9 }
  0x1c   :  { %233 = vmatpush3.bf16.msra.mxu0 %v60_v15 }
  0x1d   :  { %246 = vmatprep.subr.bf16.mxu0 %v312_v1  ;;  %p290_p12 = pnand %p289_p11, %p283_p8 }
  0x94   :  { %v45_v18 = vpop.permute.xlu0 %44 }
  0x95   :  { %vm46_vm2 = vcmp.eq.s32.totalorder %v34_v17, %v45_v18 }
  0x96   :  { %v47_v19 = vsel %vm46_vm2, 1.0, %v312_v1 }
  0x97   :  { %v48_v20 = vpack.c.bf16 %v47_v19, %v47_v19 }
  0x98   :  { %v38_v21 = vpop.permute.xlu0 %37 }
  0x99   :  { %vm39_vm4 = vcmp.eq.s32.totalorder %v34_v17, %v38_v21  ;;  %243 = vmatmul.mubr.msk.bf16.vlgmr.msra.gmra.mrb[0].mxu1 %vm54_vm3, %v48_v20 }
  0x9a   :  { %v40_v22 = vsel %vm39_vm4, 1.0, %v312_v1 }
  0x9b   :  { %v41_v23 = vpack.c.bf16 %v40_v22, %v40_v22 }
  0x9d   :  { %235 = vmatmul.mubr.msk.bf16.vlgmr.msra.gmra.mrb[0].mxu0 %vm54_vm3, %v41_v23 }
  0x9e   :  { %248 = vmatprep.mubr.msk.bf16.mxu0 %vm313_vm1, %v312_v1 }
 0x16c   :  { %v147_v24 = vpop.f32.mrb[0].mxu1 }
 0x16d   :  { %v154_v25 = vpack.c.bf16 %v147_v24, %v147_v24  ;;  %v244_v26 = vpop.f32.mrb[1].mxu1 }
 0x16e   :  { %v150_v27 = vpop.f32.mrb[2].mxu1 }
 0x16f   :  { %v160_v28 = vsel %vm155_vm5, %v154_v25, 0  ;;  %v245_v29 = vpop.f32.mrb[3].mxu1 }
 0x170   :  { %v96_v30 = vpop.f32.mrb[0].mxu0  ;;  %247 = vmatpush3.bf16.xpose.msra.mxu0 %v160_v28 }
 0x171   :  { %v236_v31 = vpop.f32.mrb[1].mxu0  ;;  %v153_v34 = vpack.c.bf16 %v96_v30, %v96_v30 }
 0x172   :  { %v99_v32 = vpop.f32.mrb[2].mxu0 }
 0x173   :  { %v237_v33 = vpop.f32.mrb[3].mxu0 }
 0x177   :  { %249 = vmatmul.mubr.msk.bf16.vlgmr.msra.gmra.mrb[4].mxu0 %vm155_vm5, %v153_v34 }
 0x24a   :  { %v196_v35 = vpop.f32.mrb[4].mxu0 }
 0x24b   :  { %v250_v36 = vpop.f32.mrb[5].mxu0  ;;  %203 = vst.msk [vmem:[#allocation5] sm:$0xff] %vm202_vm6, %v196_v35 }
 0x24c   :  { %v199_v37 = vpop.f32.mrb[6].mxu0 }
 0x24d   :  { %293 = shalt.err (!%p290_p12)
}
 0x24e   :  { %s294_s14 = scalar_lea.hbm %s386_s4, 128 }
 0x24f   :  { %p295_p13 = scmp.ne.s32.totalorder %s386_s4, %s294_s14  ;;  %p298_p0 = scmp.lt.u32.totalorder %s294_s14, %s386_s4 }
 0x251   :  { %p300_p1 = pnand %p298_p0, %p295_p13 }
 0x253   :  { %303 = shalt.err (!%p300_p1)
}
 0x254   :  { %213 = dma.vmem_to_hbm [thread:$0]  %s211_s2, 128, %s386_s4, [#allocation4]   ;;  %v251_v38 = vpop.f32.mrb[7].mxu0 }
 0x255   :  { %306 = dma.done.wait [#allocation4], 128  }
 0x256   :  { %307 = vsyncadd [#allocation4], 4294967168 }
 0x257   :  { %217 = vsyncpa [#allocation3], 1 }
 0x258   :  { %218 = vsyncpa [#allocation4], 1 }

</bundles_post_ra>
